<compile_context>
chip_gen: v7x
topology: tpu7x:2x2x1
jax: 0.10.0
libtpu: 0.0.40
codegen_flags: <defaults>
</compile_context>

<pallas_src>
import functools
import math

import jax
import jax.numpy as jnp
from jax.experimental import pallas as pl
from jax.experimental.pallas import tpu as pltpu


def _round_up(x, m):
    return ((x + m - 1) // m) * m


def _controller_instinct_kernel(
    x_ref,
    w1_ref, b1_ref,
    w2_ref, b2_ref,
    wh_ref, bh_ref,          # fused head: [H, 2*D_out], [1, 2*D_out]
    out_ref,                 # packed output: [B_TILE, 2*D_out]
    *, d_out,
):
    """Fused MLP forward: 2 hidden ReLU layers, then packed tanh|sigmoid head."""
    x = x_ref[...]

    # controller: Linear(D_in, H) -> ReLU -> Linear(H, H) -> ReLU
    h1 = jnp.dot(x, w1_ref[...], preferred_element_type=jnp.float32) + b1_ref[...]
    h1 = jnp.maximum(h1, 0.0)
    h2 = jnp.dot(h1, w2_ref[...], preferred_element_type=jnp.float32) + b2_ref[...]
    h2 = jnp.maximum(h2, 0.0)

    # fused heads: one matmul producing [B_TILE, 2*D_out]
    z = jnp.dot(h2, wh_ref[...], preferred_element_type=jnp.float32) + bh_ref[...]

    # lanes [:d_out] -> tanh (means), lanes [d_out:] -> sigmoid (strength).
    # Single transcendental per element via tanh(x) = 2*sigmoid(2x) - 1:
    # the per-lane 2x pre-scale and 2s-1 post-affine are cheap VPU ops.
    lane = jax.lax.broadcasted_iota(jnp.int32, z.shape, 1)
    is_tanh = lane < d_out
    s = jax.nn.sigmoid(z * jnp.where(is_tanh, 2.0, 1.0))
    out_ref[...] = jnp.where(is_tanh, 2.0 * s - 1.0, s)


def _choose_tiling(B, b_tile):
    """Balanced batch tiling: padding <= 7 rows/step, even #steps when possible."""
    n_steps = max(1, pl.cdiv(B, b_tile))
    bt = _round_up(pl.cdiv(B, n_steps), 8)
    B_pad = n_steps * bt
    # Megacore (v7x): make sure there are >= 2 steps when the batch is big
    # enough, and prefer an even number of steps for balance.
    if n_steps == 1 and B_pad >= 16:
        n_steps = 2
    elif n_steps > 1 and n_steps % 2 == 1:
        n_steps += 1
    bt = _round_up(pl.cdiv(B, n_steps), 8)
    B_pad = n_steps * bt
    return bt, n_steps, B_pad


def controller_instinct_forward(x, params, *, b_tile=2048,
                                compute_dtype=jnp.float32):
    """x: [B, D_in] float32. params: dict with fused-head weights (see init).

    Returns (means, strength_signal), each [B, D_out] float32.
    """
    B, D_in = x.shape
    H = params["w1"].shape[1]
    D2 = params["wh"].shape[1]          # 2 * D_out
    D_out = D2 // 2

    bt, n_steps, B_pad = _choose_tiling(B, b_tile)
    if B_pad != B:
        x = jnp.pad(x, ((0, B_pad - B), (0, 0)))
    grid = (n_steps,)

    # Optional bf16 operands (v5e's MXU is bf16-native); accumulation stays f32.
    if compute_dtype != jnp.float32:
        x = x.astype(compute_dtype)
        wcast = {k: params[k].astype(compute_dtype)
                 for k in ("w1", "b1", "w2", "b2", "wh", "bh")}
    else:
        wcast = params
    in_bytes = jnp.dtype(compute_dtype).itemsize

    # VMEM budget: resident weights + double-buffered x/out tiles
    # + in-kernel activation temporaries (h1, h2, z) + headroom.
    weight_bytes = in_bytes * (D_in * H + H + H * H + H + H * D2 + D2)
    io_tile_bytes = bt * (in_bytes * D_in + 4 * D2)   # one x tile + one out tile
    act_bytes = 4 * bt * (2 * H + D2)                 # h1, h2, z (f32)
    vmem_limit = min(weight_bytes + 2 * io_tile_bytes + act_bytes + (4 << 20),
                     48 << 20)

    cost = pl.CostEstimate(
        flops=2 * B_pad * (D_in * H + H * H + H * D2),
        transcendentals=B_pad * D2,
        bytes_accessed=B_pad * (in_bytes * D_in + 4 * D2) + weight_bytes,
    )

    # Weights / biases: full-array blocks, constant index_map -> VMEM-resident.
    def resident(shape):
        return pl.BlockSpec(shape, lambda i: (0, 0))

    packed = pl.pallas_call(
        functools.partial(_controller_instinct_kernel, d_out=D_out),
        out_shape=jax.ShapeDtypeStruct((B_pad, D2), jnp.float32),
        grid=grid,
        in_specs=[
            pl.BlockSpec((bt, D_in), lambda i: (i, 0)),      # x tile (pipelined)
            resident((D_in, H)), resident((1, H)),           # w1, b1
            resident((H, H)), resident((1, H)),              # w2, b2
            resident((H, D2)), resident((1, D2)),            # fused head w, b
        ],
        out_specs=pl.BlockSpec((bt, D2), lambda i: (i, 0)),  # packed out tile
        compiler_params=pltpu.CompilerParams(
            dimension_semantics=("parallel",),
            vmem_limit_bytes=vmem_limit,
        ),
        cost_estimate=cost,
    )(
        x,
        wcast["w1"], wcast["b1"],
        wcast["w2"], wcast["b2"],
        wcast["wh"], wcast["bh"],
    )

    packed = packed[:B]
    return packed[:, :D_out], packed[:, D_out:]


def init_params(key, d_in, h, d_out):
    """Deterministic init mimicking nn.Linear's uniform(-1/sqrt(fan_in), +...).

    Weights are stored pre-transposed ([fan_in, fan_out]) and the two head
    layers are concatenated along the output axis (tanh head first).
    """
    keys = jax.random.split(key, 8)

    def linear(kw, kb, fan_in, fan_out):
        bound = 1.0 / math.sqrt(fan_in)
        w = jax.random.uniform(kw, (fan_in, fan_out), jnp.float32, -bound, bound)
        b = jax.random.uniform(kb, (1, fan_out), jnp.float32, -bound, bound)
        return w, b

    w1, b1 = linear(keys[0], keys[1], d_in, h)
    w2, b2 = linear(keys[2], keys[3], h, h)
    w3, b3 = linear(keys[4], keys[5], h, d_out)   # tanh head
    w4, b4 = linear(keys[6], keys[7], h, d_out)   # sigmoid head
    wh = jnp.concatenate([w3, w4], axis=1)        # [H, 2*D_out]
    bh = jnp.concatenate([b3, b4], axis=1)        # [1, 2*D_out]
    return dict(w1=w1, b1=b1, w2=w2, b2=b2, wh=wh, bh=bh,
                w3=w3, b3=b3, w4=w4, b4=b4)


def reference_forward(x, p):
    """Plain-JAX reference (same math as the PyTorch module)."""
    h = jnp.maximum(x @ p["w1"] + p["b1"], 0.0)
    h = jnp.maximum(h @ p["w2"] + p["b2"], 0.0)
    means = jnp.tanh(h @ p["w3"] + p["b3"])
    strength = jax.nn.sigmoid(h @ p["w4"] + p["b4"])
    return means, strength


if __name__ == "__main__":
    D_in, H, D_out = 32, 64, 16

    key = jax.random.PRNGKey(0)
    k_x, k_p, k_x2 = jax.random.split(key, 3)
    params = init_params(k_p, D_in, H, D_out)

    # Case 1: small batch, single grid step.
    B = 8
    x = jax.random.normal(k_x, (B, D_in), jnp.float32)
    means, strength = controller_instinct_forward(x, params)
    means = jax.block_until_ready(means)
    strength = jax.block_until_ready(strength)
    ref_means, ref_strength = reference_forward(x, params)
    assert means.shape == (B, D_out) and strength.shape == (B, D_out)
    assert jnp.allclose(means, ref_means, atol=1e-5, rtol=1e-5)
    assert jnp.allclose(strength, ref_strength, atol=1e-5, rtol=1e-5)

    # Case 2: ragged batch (exercises padding + the 2-step / megacore grid).
    B2 = 13
    x2 = jax.random.normal(k_x2, (B2, D_in), jnp.float32)
    m2, s2 = controller_instinct_forward(x2, params)
    m2 = jax.block_until_ready(m2)
    s2 = jax.block_until_ready(s2)
    rm2, rs2 = reference_forward(x2, params)
    assert m2.shape == (B2, D_out) and s2.shape == (B2, D_out)
    assert jnp.allclose(m2, rm2, atol=1e-5, rtol=1e-5)
    assert jnp.allclose(s2, rs2, atol=1e-5, rtol=1e-5)

    print("KERNEL_OK")
</pallas_src>

<mosaic_0001>
module attributes {stable_mosaic.version = 11 : i64} {
  func.func @_controller_instinct_kernel(%arg0: i32, %arg1: memref<8x32xf32, #tpu.memory_space<vmem>>, %arg2: memref<32x64xf32, #tpu.memory_space<vmem>>, %arg3: memref<1x64xf32, #tpu.memory_space<vmem>>, %arg4: memref<64x64xf32, #tpu.memory_space<vmem>>, %arg5: memref<1x64xf32, #tpu.memory_space<vmem>>, %arg6: memref<64x32xf32, #tpu.memory_space<vmem>>, %arg7: memref<1x32xf32, #tpu.memory_space<vmem>>, %arg8: memref<8x32xf32, #tpu.memory_space<vmem>>) attributes {dimension_semantics = [#tpu.dimension_semantics<parallel>], iteration_bounds = array<i64: 1>, scalar_prefetch = 0 : i64, scratch_operands = 0 : i64, tpu.core_type = #tpu.core_type<tc>, window_params = [{transform_indices = @transform_0, window_bounds = array<i64: 8, 32>}, {pipeline_mode = #tpu.pipeline_mode<synchronous>, transform_indices = @transform_1, window_bounds = array<i64: 32, 64>}, {pipeline_mode = #tpu.pipeline_mode<synchronous>, transform_indices = @transform_2, window_bounds = array<i64: 1, 64>}, {pipeline_mode = #tpu.pipeline_mode<synchronous>, transform_indices = @transform_3, window_bounds = array<i64: 64, 64>}, {pipeline_mode = #tpu.pipeline_mode<synchronous>, transform_indices = @transform_4, window_bounds = array<i64: 1, 64>}, {pipeline_mode = #tpu.pipeline_mode<synchronous>, transform_indices = @transform_5, window_bounds = array<i64: 64, 32>}, {pipeline_mode = #tpu.pipeline_mode<synchronous>, transform_indices = @transform_6, window_bounds = array<i64: 1, 32>}, {transform_indices = @transform_7, window_bounds = array<i64: 8, 32>}]} {
    %c0 = arith.constant 0 : index
    %c0_0 = arith.constant 0 : index
    %0 = vector.load %arg1[%c0, %c0_0] : memref<8x32xf32, #tpu.memory_space<vmem>>, vector<8x32xf32>
    %c0_1 = arith.constant 0 : index
    %c0_2 = arith.constant 0 : index
    %1 = vector.load %arg2[%c0_1, %c0_2] : memref<32x64xf32, #tpu.memory_space<vmem>>, vector<32x64xf32>
    %cst = arith.constant dense<0.000000e+00> : vector<8x64xf32>
    %2 = tpu.matmul %0, %1, %cst {dimension_numbers = #tpu.dot_dimension_numbers<[1], [0], [0], [1], [0, 0, 1, 1], [], []>} : vector<8x32xf32>, vector<32x64xf32>, vector<8x64xf32> -> vector<8x64xf32>
    %c0_3 = arith.constant 0 : index
    %c0_4 = arith.constant 0 : index
    %3 = vector.load %arg3[%c0_3, %c0_4] : memref<1x64xf32, #tpu.memory_space<vmem>>, vector<1x64xf32>
    %4 = vector.broadcast %3 : vector<1x64xf32> to vector<8x64xf32>
    %5 = arith.addf %2, %4 : vector<8x64xf32>
    %cst_5 = arith.constant 0.000000e+00 : f32
    %6 = vector.broadcast %cst_5 : f32 to vector<8x64xf32>
    %7 = arith.maximumf %5, %6 : vector<8x64xf32>
    %c0_6 = arith.constant 0 : index
    %c0_7 = arith.constant 0 : index
    %8 = vector.load %arg4[%c0_6, %c0_7] : memref<64x64xf32, #tpu.memory_space<vmem>>, vector<64x64xf32>
    %cst_8 = arith.constant dense<0.000000e+00> : vector<8x64xf32>
    %9 = tpu.matmul %7, %8, %cst_8 {dimension_numbers = #tpu.dot_dimension_numbers<[1], [0], [0], [1], [0, 0, 1, 1], [], []>} : vector<8x64xf32>, vector<64x64xf32>, vector<8x64xf32> -> vector<8x64xf32>
    %c0_9 = arith.constant 0 : index
    %c0_10 = arith.constant 0 : index
    %10 = vector.load %arg5[%c0_9, %c0_10] : memref<1x64xf32, #tpu.memory_space<vmem>>, vector<1x64xf32>
    %11 = vector.broadcast %10 : vector<1x64xf32> to vector<8x64xf32>
    %12 = arith.addf %9, %11 : vector<8x64xf32>
    %cst_11 = arith.constant 0.000000e+00 : f32
    %13 = vector.broadcast %cst_11 : f32 to vector<8x64xf32>
    %14 = arith.maximumf %12, %13 : vector<8x64xf32>
    %c0_12 = arith.constant 0 : index
    %c0_13 = arith.constant 0 : index
    %15 = vector.load %arg6[%c0_12, %c0_13] : memref<64x32xf32, #tpu.memory_space<vmem>>, vector<64x32xf32>
    %cst_14 = arith.constant dense<0.000000e+00> : vector<8x32xf32>
    %16 = tpu.matmul %14, %15, %cst_14 {dimension_numbers = #tpu.dot_dimension_numbers<[1], [0], [0], [1], [0, 0, 1, 1], [], []>} : vector<8x64xf32>, vector<64x32xf32>, vector<8x32xf32> -> vector<8x32xf32>
    %c0_15 = arith.constant 0 : index
    %c0_16 = arith.constant 0 : index
    %17 = vector.load %arg7[%c0_15, %c0_16] : memref<1x32xf32, #tpu.memory_space<vmem>>, vector<1x32xf32>
    %18 = vector.broadcast %17 : vector<1x32xf32> to vector<8x32xf32>
    %19 = arith.addf %16, %18 : vector<8x32xf32>
    %20 = tpu.iota {dimensions = array<i32: 1>} : vector<8x32xi32>
    %c16_i32 = arith.constant 16 : i32
    %21 = vector.broadcast %c16_i32 : i32 to vector<8x32xi32>
    %22 = arith.cmpi slt, %20, %21 : vector<8x32xi32>
    %cst_17 = arith.constant 2.000000e+00 : f32
    %cst_18 = arith.constant 1.000000e+00 : f32
    %23 = vector.broadcast %cst_17 : f32 to vector<8x32xf32>
    %24 = vector.broadcast %cst_18 : f32 to vector<8x32xf32>
    %25 = arith.select %22, %23, %24 : vector<8x32xi1>, vector<8x32xf32>
    %26 = arith.mulf %19, %25 : vector<8x32xf32>
    %27 = arith.negf %26 : vector<8x32xf32>
    %28 = math.exp %27 : vector<8x32xf32>
    %cst_19 = arith.constant 1.000000e+00 : f32
    %29 = vector.broadcast %cst_19 : f32 to vector<8x32xf32>
    %30 = arith.addf %29, %28 : vector<8x32xf32>
    %31 = arith.divf %29, %30 : vector<8x32xf32>
    %cst_20 = arith.constant 2.000000e+00 : f32
    %32 = vector.broadcast %cst_20 : f32 to vector<8x32xf32>
    %33 = arith.mulf %32, %31 : vector<8x32xf32>
    %cst_21 = arith.constant 1.000000e+00 : f32
    %34 = vector.broadcast %cst_21 : f32 to vector<8x32xf32>
    %35 = arith.subf %33, %34 : vector<8x32xf32>
    %36 = arith.select %22, %35, %31 : vector<8x32xi1>, vector<8x32xf32>
    %c0_22 = arith.constant 0 : index
    %c0_23 = arith.constant 0 : index
    %37 = vector.load %arg8[%c0_22, %c0_23] : memref<8x32xf32, #tpu.memory_space<vmem>>, vector<8x32xf32>
    tpu.vector_store %arg8[%c0_22, %c0_23], %36 {strides = array<i32>} : memref<8x32xf32, #tpu.memory_space<vmem>>, vector<8x32xf32>,
    return
  }
  func.func @transform_0(%arg0: i32) -> (i32, i32) {
    %c0_i32 = arith.constant 0 : i32
    %c0_i32_0 = arith.constant 0 : i32
    return %arg0, %c0_i32 : i32, i32
  }
  func.func @transform_1(%arg0: i32) -> (i32, i32) {
    %c0_i32 = arith.constant 0 : i32
    %c0_i32_0 = arith.constant 0 : i32
    %c0_i32_1 = arith.constant 0 : i32
    return %c0_i32, %c0_i32_0 : i32, i32
  }
  func.func @transform_2(%arg0: i32) -> (i32, i32) {
    %c0_i32 = arith.constant 0 : i32
    %c0_i32_0 = arith.constant 0 : i32
    %c0_i32_1 = arith.constant 0 : i32
    return %c0_i32, %c0_i32_0 : i32, i32
  }
  func.func @transform_3(%arg0: i32) -> (i32, i32) {
    %c0_i32 = arith.constant 0 : i32
    %c0_i32_0 = arith.constant 0 : i32
    %c0_i32_1 = arith.constant 0 : i32
    return %c0_i32, %c0_i32_0 : i32, i32
  }
  func.func @transform_4(%arg0: i32) -> (i32, i32) {
    %c0_i32 = arith.constant 0 : i32
    %c0_i32_0 = arith.constant 0 : i32
    %c0_i32_1 = arith.constant 0 : i32
    return %c0_i32, %c0_i32_0 : i32, i32
  }
  func.func @transform_5(%arg0: i32) -> (i32, i32) {
    %c0_i32 = arith.constant 0 : i32
    %c0_i32_0 = arith.constant 0 : i32
    %c0_i32_1 = arith.constant 0 : i32
    return %c0_i32, %c0_i32_0 : i32, i32
  }
  func.func @transform_6(%arg0: i32) -> (i32, i32) {
    %c0_i32 = arith.constant 0 : i32
    %c0_i32_0 = arith.constant 0 : i32
    %c0_i32_1 = arith.constant 0 : i32
    return %c0_i32, %c0_i32_0 : i32, i32
  }
  func.func @transform_7(%arg0: i32) -> (i32, i32) {
    %c0_i32 = arith.constant 0 : i32
    %c0_i32_0 = arith.constant 0 : i32
    return %arg0, %c0_i32 : i32, i32
  }
}

</mosaic_0001>

<bundles_post_ra>
// kernel: tpu_custom_call.1
= control target key start
LH: loop header
LB: loop body
LE: loop exit
PB: predicated region body
PF: predicated region fallthrough
CT: control target
= control target key end

     0   :  { %v464_v3 = vmov 0.0|0.0   ;;  %vm465_vm0 = vmmov 0   ;;  %v466_v6 = vmov 0.0   ;;  %s600_s0 = inlined_call_operand.vmem [shape: f32[8,32], index: 0, kind: input, shape index: {}]   ;;  %s601_s1 = inlined_call_operand.vmem [shape: f32[32,64], index: 1, kind: input, shape index: {}]   ;;  %s602_s2 = inlined_call_operand.vmem [shape: f32[1,64], index: 2, kind: input, shape index: {}]   ;;  %s603_s3 = inlined_call_operand.vmem [shape: f32[64,64], index: 3, kind: input, shape index: {}]   ;;  %s604_s4 = inlined_call_operand.vmem [shape: f32[1,64], index: 4, kind: input, shape index: {}]   ;;  %s605_s5 = inlined_call_operand.vmem [shape: f32[64,32], index: 5, kind: input, shape index: {}]   ;;  %s606_s6 = inlined_call_operand.vmem [shape: f32[1,32], index: 6, kind: input, shape index: {}]   ;;  %s607_s7 = inlined_call_operand.hbm [shape: f32[8,32], index: 7, kind: output, shape index: {}]  }
   0x1   :  { %v28_v0 = vld [vmem:[%s601_s1] sm:$0xff]  ;;  %v29_v1 = vld [vmem:[%s601_s1 + $0x8] sm:$0xff]  ;;  %v30_v2 = vld [vmem:[%s601_s1 + $0x10] sm:$0xff]  ;;  %401 = vmatprep.subr.bf16.mxu0 %v464_v3  ;;  %360 = vmatprep.mubr.msk.f32.mxu0 %vm465_vm0, %v466_v6 }
   0x2   :  { %v402_v4 = vpack.c.bf16 %v29_v1, %v28_v0  ;;  %v31_v5 = vld [vmem:[%s601_s1 + $0x18] sm:$0xff]  ;;  %v114_v7 = vld [vmem:[%s603_s3] sm:$0xff]  ;;  %407 = vmatprep.subr.bf16.mxu1 %v464_v3  ;;  %v115_v8 = vld [vmem:[%s603_s3 + $0x8] sm:$0xff]  ;;  %379 = vmatprep.mubr.msk.f32.mxu1 %vm465_vm0, %v466_v6 }
   0x3   :  { %v116_v9 = vld [vmem:[%s603_s3 + $0x10] sm:$0xff]  ;;  %v117_v10 = vld [vmem:[%s603_s3 + $0x18] sm:$0xff]  ;;  %v405_v11 = vpack.c.bf16 %v31_v5, %v30_v2  ;;  %v408_v12 = vpack.c.bf16 %v115_v8, %v114_v7 }
   0x4   :  { %403 = vmatpush3.bf16.msra.mxu0 %v402_v4 }
   0x5   :  { %404 = vmatprep.subr.bf16.mxu0 %v464_v3 }
   0x6   :  { %12 = vsyncpa [#allocation3], 0  ;;  %409 = vmatpush3.bf16.msra.mxu1 %v408_v12  ;;  %v411_v13 = vpack.c.bf16 %v117_v10, %v116_v9  ;;  %v118_v14 = vld [vmem:[%s603_s3 + $0x20] sm:$0xff]  ;;  %v119_v15 = vld [vmem:[%s603_s3 + $0x28] sm:$0xff]  ;;  %vm39_vm1 = vcmask 261120   ;;  %vm129_vm2 = vcmask 523264   ;;  %v292_v43 = vlaneseq }
   0x7   :  { %410 = vmatprep.subr.bf16.mxu1 %v464_v3  ;;  %v27_v16 = vld [vmem:[%s600_s0] sm:$0xff]  ;;  %v414_v17 = vpack.c.bf16 %v119_v15, %v118_v14  ;;  %v120_v18 = vld [vmem:[%s603_s3 + $0x30] sm:$0xff]  ;;  %v121_v19 = vld [vmem:[%s603_s3 + $0x38] sm:$0xff]  ;;  %v467_v47 = vmov 1.0  }
   0x8   :  { %406 = vmatpush3.bf16.msra.mxu0 %v405_v11  ;;  %v417_v20 = vpack.c.bf16 %v121_v19, %v120_v18  ;;  %v204_v21 = vld [vmem:[%s605_s5] sm:$0xff]  ;;  %v205_v22 = vld [vmem:[%s605_s5 + $0x8] sm:$0xff]  ;;  %v206_v23 = vld [vmem:[%s605_s5 + $0x10] sm:$0xff]  ;;  %v293_v44 = vand.u32 127, %v292_v43 }
   0x9   :  { %419 = vmatprep.subr.bf16.mxu0 %v464_v3  ;;  %v420_v24 = vpack.c.bf16 %v205_v22, %v204_v21  ;;  %v207_v25 = vld [vmem:[%s605_s5 + $0x18] sm:$0xff]  ;;  %v208_v27 = vld [vmem:[%s605_s5 + $0x20] sm:$0xff]  ;;  %v209_v28 = vld [vmem:[%s605_s5 + $0x28] sm:$0xff] }
   0xa   :  { %412 = vmatpush3.bf16.msra.mxu1 %v411_v13  ;;  %v423_v26 = vpack.c.bf16 %v207_v25, %v206_v23  ;;  %v426_v29 = vpack.c.bf16 %v209_v28, %v208_v27  ;;  %v321_v30 = vld [vmem:[%s602_s2] ss:$0 sm:$0xff]  ;;  %v210_v35 = vld [vmem:[%s605_s5 + $0x30] sm:$0xff]  ;;  %v211_v36 = vld [vmem:[%s605_s5 + $0x38] sm:$0xff]  ;;  %vm294_vm3 = vcmp.lt.s32.totalorder %v293_v44, 16 }
   0xb   :  { %361 = vmatmul.mubr.msk.f32.vlgmr.msra.gmra.mrb[0].mxu0 %vm39_vm1, %v27_v16  ;;  %413 = vmatprep.subr.bf16.mxu1 %v464_v3  ;;  %v429_v37 = vpack.c.bf16 %v211_v36, %v210_v35  ;;  %v323_v38 = vld [vmem:[%s604_s4] ss:$0 sm:$0xff]  ;;  %v295_v48 = vsel %vm294_vm3, 2.0, %v467_v47  ;;  %s468_s4 = smov [#allocation2]  }
   0xc   :  { %398 = vmatprep.mubr.msk.f32.mxu0 %vm465_vm0, %v466_v6  ;;  %421 = vmatpush3.bf16.msra.mxu0 %v420_v24  ;;  %v325_v45 = vld [vmem:[%s606_s6] ss:$0 sm:$0xff]  ;;  %s313_s5 = sshll.u32 %s468_s4, 4  ;;  %s314_s5 = int_to_ptr.vmem [resolvable:$true] %s313_s5 }
   0xd   :  { %422 = vmatprep.subr.bf16.mxu0 %v464_v3  ;;  %s440_s6 = scalar_lea.vmem %s314_s5, 128  ;;  %p445_p1 = scmp.lt.s32.totalorder %s314_s5, %s314_s5 }
   0xe   :  { %415 = vmatpush3.bf16.msra.mxu1 %v414_v17  ;;  %p441_p0 = scmp.ne.s32.totalorder %s314_s5, %s440_s6  ;;  %p446_p2 = scmp.lt.s32.totalorder %s440_s6, %s440_s6 }
   0xf   :  { %416 = vmatprep.subr.bf16.mxu1 %v464_v3 }
  0x10   :  { %424 = vmatpush3.bf16.msra.mxu0 %v423_v26  ;;  %p447_p3 = por %p446_p2, %p445_p1 }
  0x11   :  { %425 = vmatprep.subr.bf16.mxu0 %v464_v3 }
  0x12   :  { %418 = vmatpush3.bf16.msra.mxu1 %v417_v20  ;;  %p448_p4 = pnand %p447_p3, %p441_p0 }
  0x14   :  { %427 = vmatpush3.bf16.msra.mxu0 %v426_v29 }
  0x15   :  { %428 = vmatprep.subr.bf16.mxu0 %v464_v3 }
  0x18   :  { %430 = vmatpush3.bf16.msra.mxu0 %v429_v37 }
  0xde   :  { %v109_v31 = vpop.f32.mrb[0].mxu0 }
  0xdf   :  { %v110_v32 = vadd.f32 %v321_v30, %v109_v31  ;;  %v362_v33 = vpop.f32.mrb[1].mxu0 }
  0xe1   :  { %v113_v34 = vmax.f32 %v110_v32, 0.0 }
  0xe3   :  { %380 = vmatmul.mubr.msk.f32.vlgmr.msra.gmra.mrb[0].mxu1 %vm129_vm2, %v113_v34 }
 0x1b6   :  { %v199_v39 = vpop.f32.mrb[0].mxu1 }
 0x1b7   :  { %v200_v40 = vadd.f32 %v323_v38, %v199_v39  ;;  %v381_v41 = vpop.f32.mrb[1].mxu1 }
 0x1b9   :  { %v203_v42 = vmax.f32 %v200_v40, 0.0 }
 0x1bb   :  { %399 = vmatmul.mubr.msk.f32.vlgmr.msra.gmra.mrb[2].mxu0 %vm129_vm2, %v203_v42 }
 0x28e   :  { %v288_v46 = vpop.f32.mrb[2].mxu0 }
 0x28f   :  { %v289_v49 = vadd.f32 %v325_v45, %v288_v46  ;;  %v400_v50 = vpop.f32.mrb[3].mxu0 }
 0x291   :  { %v296_v51 = vmul.f32 %v295_v48, %v289_v49 }
 0x293   :  { %v327_v52 = vmul.f32 -1.442695, %v296_v51 }
 0x295   :  { %436 = vpow2.f32 %v327_v52 }
 0x29f   :  { %v437_v53 = vpop.eup %436 }
 0x2a0   :  { %v300_v54 = vadd.f32 1.0, %v437_v53 }
 0x2a2   :  { %438 = vrcp.f32 %v300_v54 }
 0x2ac   :  { %v439_v55 = vpop.eup %438 }
 0x2ad   :  { %v303_v56 = vmul.f32 2.0, %v439_v55 }
 0x2af   :  { %v328_v57 = vadd.f32 -1.0, %v303_v56 }
 0x2b1   :  { %v305_v58 = vsel %vm294_vm3, %v328_v57, %v439_v55 }
 0x2b2   :  { %306 = vst.msk [vmem:[#allocation2] sm:$0xff] %vm39_vm1, %v305_v58 }
 0x2b3   :  { %451 = shalt.err (!%p448_p4)
}
 0x2b4   :  { %s452_s23 = scalar_lea.hbm %s607_s7, 128 }
 0x2b5   :  { %p453_p5 = scmp.ne.s32.totalorder %s607_s7, %s452_s23  ;;  %p456_p6 = scmp.lt.u32.totalorder %s452_s23, %s607_s7 }
 0x2b7   :  { %p458_p7 = pnand %p456_p6, %p453_p5 }
 0x2b9   :  { %461 = shalt.err (!%p458_p7)
}
 0x2ba   :  { %316 = dma.vmem_to_hbm [thread:$0]  %s314_s5, 128, %s607_s7, [#allocation3]  }
 0x2bb   :  { %462 = dma.done.wait [#allocation3], 128  }
 0x2bc   :  { %463 = vsyncadd [#allocation3], 4294967168 }
 0x2bd   :  { %320 = vsyncpa [#allocation3], 1 }

</bundles_post_ra>
